<compile_context>
chip_gen: v5e
topology: v5e:2x2
jax: 0.10.0
libtpu: 0.0.40
codegen_flags: <defaults>
</compile_context>

<pallas_src>
import jax
import jax.numpy as jnp
from jax import lax
from jax.experimental import pallas as pl
from jax.experimental.pallas import tpu as pltpu

_EPS = 1e-12  # torch.nn.functional.normalize default eps


def _make_kernel(S, TB, batch, tiles_per_core, needs_mask):
    Sp1 = S + 1

    def kernel(m_ref, coef_ref, p_ref, out_ref):
        c = pl.program_id(0)          # TensorCore shard ("parallel", v7x megacore)
        j = pl.program_id(1)          # batch-tile index within shard ("arbitrary")

        @pl.when(j == 0)
        def _init():
            out_ref[...] = jnp.zeros_like(out_ref)

        # One MXU matmul gives both the flipped cumulative sums (rows 0..S-1)
        # and the L1 denominator sum_s pc[s,:] (row S) for this batch tile.
        pc = jnp.dot(m_ref[...], p_ref[...],
                     preferred_element_type=jnp.float32,
                     precision=lax.Precision.HIGHEST)            # (S+1, TB) f32

        if needs_mask:
            # Only the partial last tile has lanes past the real batch; set them
            # to 1.0 before the log so they contribute exactly 0 to every sum.
            valid = batch - (c * tiles_per_core + j) * TB
            lane = lax.broadcasted_iota(jnp.int32, (Sp1, TB), 1)
            pc = jnp.where(lane < valid, pc, 1.0)

        # torch F.normalize clamps only the denominator with eps; numerator rows
        # keep exact zeros (log -> -inf), matching torch.kl_div semantics.
        row = lax.broadcasted_iota(jnp.int32, (Sp1, 1), 0)
        pc = jnp.maximum(pc, jnp.where(row == S, jnp.float32(_EPS), 0.0))

        l_all = jnp.sum(jnp.log(pc), axis=1, keepdims=True)      # (S+1, 1)
        coef = coef_ref[...]                                      # (S+1, 1)
        # Zero-coefficient rows are excluded entirely (torch zeroes the whole
        # term when the target is 0, even against log(0) = -inf).
        contrib = -jnp.sum(jnp.where(coef != 0.0, coef * l_all, 0.0),
                           keepdims=True)                         # (1, 1)

        out_ref[...] += contrib       # scalar broadcast over this core's (8,128) block

    return kernel


def response_time_loss(p_halts, rt_true, max_steps, *, block_b=None,
                       vmem_budget_bytes=12 * 1024 * 1024):
    """Pallas equivalent of ResponseTimeLoss(max_steps)(p_halts, rt_true).

    p_halts: (steps, batch) float (halting probabilities, assumed >= 0);
    rt_true: (batch, steps) int, values in [0, max_steps).
    """
    S, B = p_halts.shape
    assert S == max_steps, "torch .expand() in rt_dist_loss requires steps == max_steps"
    assert rt_true.shape[0] == B

    dtype = p_halts.dtype             # keep native dtype (bf16 halves HBM reads)
    f32 = jnp.float32

    # ---- batch-invariant target path: O(B*S) + O(S), stays in the wrapper ----
    counts = jnp.bincount(rt_true.reshape(-1).astype(jnp.int32),
                          length=S).astype(f32)                      # (S,)
    tc = jnp.flip(jnp.cumsum(counts))                                # flip(cumsum)
    t_norm = tc / jnp.maximum(jnp.sum(tc), f32(_EPS))                # L1 norm (counts >= 0)
    t_sum = jnp.sum(t_norm)
    t_logt = jnp.sum(t_norm * jnp.log(jnp.where(t_norm > 0.0, t_norm, 1.0)))
    # coef rows 0..S-1 = t_norm, row S = -t_sum:
    #   KL total (pre-batchmean) = B*sum t*log t - sum_tiles sum_rows coef * l_all
    coef = jnp.concatenate([t_norm, (-t_sum).reshape(1)]).reshape(S + 1, 1)

    # ---- flip-cumsum + denominator matrix (grid-invariant MXU operand) ----
    # NOTE: p_halts is assumed non-negative (softmax output), so the L1 norm
    # denominator sum_s |pc| == sum_s pc == sum_k (k+1) p[k] (row S below).
    i = jnp.arange(S + 1)[:, None]
    k = jnp.arange(S)[None, :]
    m_aug = ((i + k <= S - 1).astype(f32)
             + jnp.where(i == S, (S - k).astype(f32), 0.0)).astype(dtype)   # (S+1, S)

    # ---- batch tiling: lane-dense VMEM-sized tiles, no pad copy ----
    itemsize = jnp.dtype(dtype).itemsize
    # double-buffered input tile + f32 (S+1, TB) intermediate must fit the
    # default scoped VMEM on every generation (16 MiB on v5e, 32 on v6e/v7x).
    per_col_bytes = 2 * itemsize * S + 2 * 4 * (S + 1)
    tb_vmem = max(128, (vmem_budget_bytes // per_col_bytes // 128) * 128)
    tb_cap = block_b if block_b is not None else 8192
    tb = max(128, min(tb_vmem, tb_cap))
    if B <= tb:
        tb, n_tiles, needs_mask = B, 1, False       # single full-extent block
    else:
        n_tiles = pl.cdiv(B, tb)
        needs_mask = (n_tiles * tb != B)            # partial last tile -> masked in-kernel
    # v7x: shard an even tile count across both TensorCores ("parallel" axis);
    # odd counts (and the single-tile case) fall back to one accumulator.
    n_cores = 2 if (n_tiles >= 2 and n_tiles % 2 == 0) else 1
    tiles_per_core = n_tiles // n_cores

    cost = pl.CostEstimate(
        flops=2 * (S + 1) * S * B + 8 * (S + 1) * B,
        transcendentals=(S + 1) * B,
        bytes_accessed=itemsize * S * B + 4 * ((S + 1) * (S + 1) + 8 * n_cores * 128),
    )

    out = pl.pallas_call(
        _make_kernel(S, tb, B, tiles_per_core, needs_mask),
        out_shape=jax.ShapeDtypeStruct((8 * n_cores, 128), f32),
        grid_spec=pltpu.PrefetchScalarGridSpec(
            num_scalar_prefetch=0,
            grid=(n_cores, tiles_per_core),
            in_specs=[
                pl.BlockSpec((S + 1, S), lambda c, j: (0, 0)),   # m_aug (grid-invariant)
                pl.BlockSpec((S + 1, 1), lambda c, j: (0, 0)),   # coef  (grid-invariant)
                pl.BlockSpec((S, tb),
                             lambda c, j: (0, c * tiles_per_core + j)),  # p tile
            ],
            out_specs=pl.BlockSpec((8, 128), lambda c, j: (c, 0)),  # per-core accumulator
        ),
        compiler_params=pltpu.CompilerParams(
            dimension_semantics=("parallel", "arbitrary"),
        ),
        cost_estimate=cost,
    )(m_aug, coef, p_halts)

    acc = jnp.sum(out[::8, 0])        # one replicated partial per TensorCore block
    # TODO(synk): the `trial_types is not None` branch needs data-dependent
    # torch.unique masking; only the default forward path (trial_types=None)
    # is kernelized.
    return t_logt + acc / f32(B)


def _ref_loss(p_halts, rt_true, max_steps):
    """Pure-JAX reference mirroring the torch code, for a sanity check."""
    p = jnp.asarray(p_halts, jnp.float32).T      # (B, S)
    B, S = p.shape
    counts = jnp.bincount(rt_true.reshape(-1), length=max_steps).astype(jnp.float32)
    t = jnp.broadcast_to(counts[None, :], (B, S))
    pc = jnp.flip(jnp.cumsum(p, axis=1), axis=1)
    tc = jnp.flip(jnp.cumsum(t, axis=1), axis=1)
    pn = pc / jnp.maximum(jnp.sum(jnp.abs(pc), axis=1, keepdims=True), _EPS)
    tn = tc / jnp.maximum(jnp.sum(jnp.abs(tc), axis=1, keepdims=True), _EPS)
    elem = jnp.where(tn > 0, tn * (jnp.log(jnp.where(tn > 0, tn, 1.0)) - jnp.log(pn)), 0.0)
    return jnp.sum(elem) / B


if __name__ == "__main__":
    key = jax.random.PRNGKey(0)
    k1, k2, k3, k4, k5, k6 = jax.random.split(key, 6)

    # Case 1: tiny single-block f32 path (grid (1,1), no masking).
    S1, B1 = 16, 8
    p1 = jax.nn.softmax(jax.random.normal(k1, (S1, B1), jnp.float32), axis=0)
    rt1 = jax.random.randint(k2, (B1, S1), 0, S1, dtype=jnp.int32)
    out1 = response_time_loss(p1, rt1, S1)
    jax.block_until_ready(out1)
    ref1 = _ref_loss(p1, rt1, S1)
    assert jnp.allclose(out1, ref1, atol=1e-4, rtol=1e-3), (out1, ref1)

    # Case 2: tiled path, odd tile count (single-core grid (1,3)), masked
    # partial last tile, f32 input.
    S2, B2 = 16, 300
    p2 = jax.nn.softmax(jax.random.normal(k3, (S2, B2), jnp.float32), axis=0)
    rt2 = jax.random.randint(k4, (B2, S2), 0, S2, dtype=jnp.int32)
    out2 = response_time_loss(p2, rt2, S2, block_b=128)
    jax.block_until_ready(out2)
    ref2 = _ref_loss(p2, rt2, S2)
    assert jnp.allclose(out2, ref2, atol=2e-4, rtol=2e-3), (out2, ref2)

    # Case 3: dual-accumulator grid (2,3), masked partial last tile, bf16 input
    # (native-dtype path; reference sees the same bf16-rounded probabilities).
    S3, B3 = 16, 700
    p3 = jax.nn.softmax(jax.random.normal(k5, (S3, B3), jnp.float32), axis=0
                        ).astype(jnp.bfloat16)
    rt3 = jax.random.randint(k6, (B3, S3), 0, S3, dtype=jnp.int32)
    out3 = response_time_loss(p3, rt3, S3, block_b=128)
    jax.block_until_ready(out3)
    ref3 = _ref_loss(p3.astype(jnp.float32), rt3, S3)
    assert jnp.allclose(out3, ref3, atol=2e-3, rtol=2e-2), (out3, ref3)

    print("KERNEL_OK")
</pallas_src>

<mosaic_0001>
module attributes {stable_mosaic.version = 11 : i64} {
  func.func @kernel(%arg0: i32, %arg1: i32, %arg2: memref<17x16xf32, #tpu.memory_space<vmem>>, %arg3: memref<17x1xf32, #tpu.memory_space<vmem>>, %arg4: memref<16x8xf32, #tpu.memory_space<vmem>>, %arg5: memref<8x128xf32, #tpu.memory_space<vmem>>) attributes {dimension_semantics = [#tpu.dimension_semantics<parallel>, #tpu.dimension_semantics<arbitrary>], iteration_bounds = array<i64: 1, 1>, scalar_prefetch = 0 : i64, scratch_operands = 0 : i64, tpu.core_type = #tpu.core_type<tc>, window_params = [{pipeline_mode = #tpu.pipeline_mode<synchronous>, transform_indices = @transform_0, window_bounds = array<i64: 17, 16>}, {pipeline_mode = #tpu.pipeline_mode<synchronous>, transform_indices = @transform_1, window_bounds = array<i64: 17, 1>}, {transform_indices = @transform_2, window_bounds = array<i64: 16, 8>}, {transform_indices = @transform_3, window_bounds = array<i64: 8, 128>}]} {
    %c0_i32 = arith.constant 0 : i32
    %0 = arith.cmpi eq, %arg1, %c0_i32 : i32
    %1 = arith.extui %0 : i1 to i32
    %c0_i32_0 = arith.constant 0 : i32
    %2 = arith.cmpi ne, %1, %c0_i32_0 : i32
    scf.if %2 {
      %cst_17 = arith.constant 0.000000e+00 : f32
      %34 = vector.broadcast %cst_17 : f32 to vector<8x128xf32>
      %c0_18 = arith.constant 0 : index
      %c0_19 = arith.constant 0 : index
      %35 = vector.load %arg5[%c0_18, %c0_19] : memref<8x128xf32, #tpu.memory_space<vmem>>, vector<8x128xf32>
      tpu.vector_store %arg5[%c0_18, %c0_19], %34 {strides = array<i32>} : memref<8x128xf32, #tpu.memory_space<vmem>>, vector<8x128xf32>,
    } else {
    }
    %c0 = arith.constant 0 : index
    %c0_1 = arith.constant 0 : index
    %3 = vector.load %arg2[%c0, %c0_1] : memref<17x16xf32, #tpu.memory_space<vmem>>, vector<17x16xf32>
    %c0_2 = arith.constant 0 : index
    %c0_3 = arith.constant 0 : index
    %4 = vector.load %arg4[%c0_2, %c0_3] : memref<16x8xf32, #tpu.memory_space<vmem>>, vector<16x8xf32>
    %cst = arith.constant dense<0.000000e+00> : vector<17x8xf32>
    %5 = tpu.matmul %3, %4, %cst {dimension_numbers = #tpu.dot_dimension_numbers<[1], [0], [0], [1], [0, 0, 1, 1], [], []>, precision = #tpu.contract_precision<fp32>} : vector<17x16xf32>, vector<16x8xf32>, vector<17x8xf32> -> vector<17x8xf32>
    %6 = tpu.iota {dimensions = array<i32: 0>} : vector<17x1xi32>
    %c16_i32 = arith.constant 16 : i32
    %7 = vector.broadcast %c16_i32 : i32 to vector<17x1xi32>
    %8 = arith.cmpi eq, %6, %7 : vector<17x1xi32>
    %cst_4 = arith.constant 9.99999996E-13 : f32
    %cst_5 = arith.constant 0.000000e+00 : f32
    %9 = vector.broadcast %cst_4 : f32 to vector<17x1xf32>
    %10 = vector.broadcast %cst_5 : f32 to vector<17x1xf32>
    %11 = arith.select %8, %9, %10 : vector<17x1xi1>, vector<17x1xf32>
    %12 = vector.broadcast %11 : vector<17x1xf32> to vector<17x8xf32>
    %13 = arith.maximumf %5, %12 : vector<17x8xf32>
    %14 = math.log %13 : vector<17x8xf32>
    %cst_6 = arith.constant dense<0.000000e+00> : vector<17xf32>
    %15 = vector.multi_reduction <add>, %14, %cst_6 [1] : vector<17x8xf32> to vector<17xf32>
    %16 = vector.shape_cast %15 : vector<17xf32> to vector<17x1xf32>
    %c0_7 = arith.constant 0 : index
    %c0_8 = arith.constant 0 : index
    %17 = vector.load %arg3[%c0_7, %c0_8] : memref<17x1xf32, #tpu.memory_space<vmem>>, vector<17x1xf32>
    %cst_9 = arith.constant 0.000000e+00 : f32
    %18 = vector.broadcast %cst_9 : f32 to vector<17x1xf32>
    %19 = arith.cmpf one, %17, %18 : vector<17x1xf32>
    %20 = arith.mulf %17, %16 : vector<17x1xf32>
    %cst_10 = arith.constant 0.000000e+00 : f32
    %21 = vector.broadcast %cst_10 : f32 to vector<17x1xf32>
    %22 = arith.select %19, %20, %21 : vector<17x1xi1>, vector<17x1xf32>
    %23 = vector.shape_cast %22 : vector<17x1xf32> to vector<1x17x1xf32>
    %cst_11 = arith.constant dense<0.000000e+00> : vector<1xf32>
    %24 = vector.multi_reduction <add>, %23, %cst_11 [1, 2] : vector<1x17x1xf32> to vector<1xf32>
    %25 = vector.shape_cast %24 : vector<1xf32> to vector<1x1x1xf32>
    %26 = vector.extract %25[0, 0, 0] : f32 from vector<1x1x1xf32>
    %27 = vector.broadcast %26 : f32 to vector<1x1xf32>
    %cst_12 = arith.constant 0.000000e+00 : f32
    %28 = vector.broadcast %cst_12 : f32 to vector<1x1xf32>
    %29 = arith.subf %28, %27 : vector<1x1xf32>
    %c0_13 = arith.constant 0 : index
    %c0_14 = arith.constant 0 : index
    %30 = vector.load %arg5[%c0_13, %c0_14] : memref<8x128xf32, #tpu.memory_space<vmem>>, vector<8x128xf32>
    %31 = vector.broadcast %29 : vector<1x1xf32> to vector<8x128xf32>
    %32 = arith.addf %30, %31 : vector<8x128xf32>
    %c0_15 = arith.constant 0 : index
    %c0_16 = arith.constant 0 : index
    %33 = vector.load %arg5[%c0_15, %c0_16] : memref<8x128xf32, #tpu.memory_space<vmem>>, vector<8x128xf32>
    tpu.vector_store %arg5[%c0_15, %c0_16], %32 {strides = array<i32>} : memref<8x128xf32, #tpu.memory_space<vmem>>, vector<8x128xf32>,
    return
  }
  func.func @transform_0(%arg0: i32, %arg1: i32) -> (i32, i32) {
    %c0_i32 = arith.constant 0 : i32
    %c0_i32_0 = arith.constant 0 : i32
    %c0_i32_1 = arith.constant 0 : i32
    return %c0_i32, %c0_i32_0 : i32, i32
  }
  func.func @transform_1(%arg0: i32, %arg1: i32) -> (i32, i32) {
    %c0_i32 = arith.constant 0 : i32
    %c0_i32_0 = arith.constant 0 : i32
    %c0_i32_1 = arith.constant 0 : i32
    return %c0_i32, %c0_i32_0 : i32, i32
  }
  func.func @transform_2(%arg0: i32, %arg1: i32) -> (i32, i32) {
    %c1_i32 = arith.constant 1 : i32
    %0 = arith.muli %arg0, %c1_i32 : i32
    %1 = arith.addi %0, %arg1 : i32
    %c0_i32 = arith.constant 0 : i32
    %c0_i32_0 = arith.constant 0 : i32
    return %c0_i32, %1 : i32, i32
  }
  func.func @transform_3(%arg0: i32, %arg1: i32) -> (i32, i32) {
    %c0_i32 = arith.constant 0 : i32
    %c0_i32_0 = arith.constant 0 : i32
    return %arg0, %c0_i32 : i32, i32
  }
}

</mosaic_0001>

<bundles_post_ra>
// kernel: tpu_custom_call.1
= control target key start
LH: loop header
LB: loop body
LE: loop exit
PB: predicated region body
PF: predicated region fallthrough
CT: control target
= control target key end

     0   :  { %vm42_vm0 = vcmask 130048   ;;  %s449_s0 = inlined_call_operand.vmem [shape: f32[17,16], index: 0, kind: input, shape index: {}]   ;;  %s450_s1 = inlined_call_operand.vmem [shape: f32[17,1], index: 1, kind: input, shape index: {}]   ;;  %s451_s2 = inlined_call_operand.vmem [shape: f32[16,8], index: 2, kind: input, shape index: {}]   ;;  %s452_s3 = inlined_call_operand.hbm [shape: f32[8,128], index: 3, kind: output, shape index: {}]  }
   0x1   :  { %v41_v0 = vld [vmem:[%s451_s2 + $0x8] sm:$0xff]  ;;  %v40_v1 = vld [vmem:[%s451_s2] sm:$0xff]  ;;  %v39_v6 = vld [vmem:[%s449_s0 + $0x10] sm:$0x1] }
   0x2   :  { %v38_v2 = vld [vmem:[%s449_s0 + $0x8] sm:$0xff]  ;;  %v66_v3 = vand.u32 4294901760, %v41_v0  ;;  %v68_v4 = vand.u32 4294901760, %v40_v1  ;;  %v37_v7 = vld [vmem:[%s449_s0] sm:$0xff]  ;;  %v50_v9 = vsel %vm42_vm0, %v39_v6, 0 }
   0x3   :  { %v47_v5 = vsel %vm42_vm0, %v38_v2, 0  ;;  %v44_v10 = vsel %vm42_vm0, %v37_v7, 0 }
   0x4   :  { %v78_v8 = vand.u32 4294901760, %v47_v5 }
   0x5   :  { %8 = vsyncpa [#allocation3], 0  ;;  %358 = vmatpush.msra.mxu2 %v66_v3  ;;  %v110_v11 = vsub.f32 %v41_v0, %v66_v3  ;;  %v116_v12 = vsub.f32 %v40_v1, %v68_v4  ;;  %v86_v13 = vand.u32 4294901760, %v50_v9  ;;  %67 = vmatpush.msra.mxu0 %v66_v3  ;;  %v70_v14 = vand.u32 4294901760, %v44_v10  ;;  %s399_s26 = smov [#allocation2]   ;;  %s343_s30 = sshll.u32 %s452_s3, 4  ;;  %s344_s30 = int_to_ptr.hbm [resolvable:$true] %s343_s30 }
   0x6   :  { %v79_v15 = vsub.f32 %v47_v5, %v78_v8  ;;  %v273_v49 = vlaneseq  ;;  %vm292_vm1 = vcmask 64512   ;;  %vm299_vm3 = vcmask 57344   ;;  %s341_s27 = sshll.u32 %s399_s26, 4  ;;  %s342_s27 = int_to_ptr.vmem [resolvable:$true] %s341_s27 }
   0x7   :  { %359 = vmatpush.msra.mxu2 %v68_v4  ;;  %v111_v16 = vand.u32 4294901760, %v110_v11  ;;  %v117_v17 = vand.u32 4294901760, %v116_v12  ;;  %v87_v18 = vsub.f32 %v50_v9, %v86_v13  ;;  %v71_v19 = vsub.f32 %v44_v10, %v70_v14  ;;  %69 = vmatpush.msra.mxu0 %v68_v4 }
   0x8   :  { %v80_v20 = vand.u32 4294901760, %v79_v15  ;;  %v274_v57 = vshrl.u32 %v273_v49, 7  ;;  %v398_v9 = vmov 0.0   ;;  %vm315_vm6 = vcmask 7168  }
   0x9   :  { %150 = vmatpush.msrb.mxu2 %v110_v11  ;;  %v112_v21 = vsub.f32 %v110_v11, %v111_v16  ;;  %v118_v22 = vsub.f32 %v116_v12, %v117_v17  ;;  %v72_v23 = vand.u32 4294901760, %v71_v19  ;;  %224 = vmatpush.msrb.mxu0 %v111_v16  ;;  %v88_v25 = vand.u32 4294901760, %v87_v18 }
   0xa   :  { %v81_v24 = vsub.f32 %v79_v15, %v80_v20  ;;  %v276_v61 = vadd.s32 16, %v274_v57  ;;  %vm319_vm8 = vcmask 0  }
   0xb   :  { %153 = vmatpush.msrb.mxu2 %v116_v12  ;;  %v113_v26 = vand.u32 4294901760, %v112_v21  ;;  %v119_v27 = vand.u32 4294901760, %v118_v22  ;;  %v73_v28 = vsub.f32 %v71_v19, %v72_v23  ;;  %228 = vmatpush.msrb.mxu0 %v117_v17  ;;  %v89_v31 = vsub.f32 %v87_v18, %v88_v25  ;;  %v303_v21 = vld [vmem:[%s450_s1] sm:$0xff] }
   0xc   :  { %v82_v29 = vand.u32 4294901760, %v81_v24  ;;  %vm279_vm2 = vcmp.eq.s32.totalorder %v276_v61, 16  ;;  %vm306_vm5 = vcmp.ne.f32.partialorder %v303_v21, 0.0 }
   0xd   :  { %360 = vmatpush.msra.mxu3 %v113_v26  ;;  %114 = vmatpush.msra.mxu1 %v113_v26  ;;  %v74_v30 = vand.u32 4294901760, %v73_v28  ;;  %v90_v32 = vand.u32 4294901760, %v89_v31  ;;  %v282_v10 = vsel %vm279_vm2, 1e-12, %v398_v9  ;;  %v305_v26 = vld [vmem:[%s450_s1 + $0x10] sm:$0x1] }
   0xe   :  { %83 = vmatmul.f32.vlgmr.msra.gmra.mxu2 %v82_v29  ;;  %vm308_vm7 = vcmp.ne.f32.partialorder %v305_v26, 0.0 }
   0xf   :  { %361 = vmatpush.msra.mxu3 %v119_v27  ;;  %120 = vmatpush.msra.mxu1 %v119_v27 }
  0x10   :  { %126 = vmatmul.f32.vlgmr.msra.gmra.mxu3 %v78_v8  ;;  %75 = vmatmul.f32.vlgmr.msra.gmra.mxu0 %v74_v30 }
  0x11   :  { %185 = vmatpush.msrb.mxu3 %v66_v3  ;;  %122 = vmatmul.f32.vlgmr.msra.gmra.mxu1 %v70_v14 }
  0x12   :  { %257 = vmatpush.msrb.mxu1 %v66_v3 }
  0x13   :  { %187 = vmatpush.msrb.mxu3 %v68_v4 }
  0x14   :  { %259 = vmatpush.msrb.mxu1 %v68_v4 }
  0x16   :  { %91 = vmatmul.f32.gmra.mxu2 %v90_v32 }
  0x18   :  { %130 = vmatmul.f32.gmra.mxu3 %v86_v13  ;;  %230 = vmatmul.f32.vlgmr.msrb.gmra.mxu0 %v70_v14 }
  0x19   :  { %261 = vmatmul.f32.vlgmr.msrb.gmra.mxu1 %v70_v14 }
  0x1e   :  { %156 = vmatmul.f32.vlgmr.msrb.gmra.mxu2 %v71_v19 }
  0x20   :  { %191 = vmatmul.f32.vlgmr.msrb.gmra.mxu3 %v72_v23  ;;  %234 = vmatmul.f32.gmra.mxu0 %v78_v8 }
  0x21   :  { %265 = vmatmul.f32.gmra.mxu1 %v78_v8 }
  0x26   :  { %161 = vmatmul.f32.gmra.mxu2 %v79_v15 }
  0x28   :  { %197 = vmatmul.f32.gmra.mxu3 %v80_v20  ;;  %238 = vmatmul.f32.gmra.mxu0 %v86_v13  ;;  %v304_v20 = vld [vmem:[%s450_s1 + $0x8] sm:$0xff] }
  0x29   :  { %269 = vmatmul.f32.gmra.mxu1 %v86_v13  ;;  %vm307_vm4 = vcmp.ne.f32.partialorder %v304_v20, 0.0 }
  0x2e   :  { %166 = vmatmul.f32.gmra.mxu2 %v87_v18 }
  0x30   :  { %203 = vmatmul.f32.gmra.mxu3 %v88_v25 }
  0x8d   :  { %v76_v35 = vpop.f32.mrf.mxu0 }
  0x8e   :  { %v123_v37 = vpop.f32.mrf.mxu1 }
  0x8f   :  { %v124_v40 = vadd.f32 %v123_v37, %v76_v35 }
  0x91   :  { %v84_v33 = vpop.f32.mrf.mxu2 }
  0x93   :  { %v127_v34 = vpop.f32.mrf.mxu3 }
  0x94   :  { %v128_v47 = vadd.f32 %v127_v34, %v84_v33 }
  0x95   :  { %v231_v39 = vpop.f32.mrf.mxu0 }
  0x96   :  { %v262_v42 = vpop.f32.mrf.mxu1 }
  0x99   :  { %v92_v36 = vpop.f32.mrf.mxu2 }
  0x9b   :  { %v131_v38 = vpop.f32.mrf.mxu3 }
  0x9c   :  { %v132_v59 = vadd.f32 %v131_v38, %v92_v36 }
  0x9d   :  { %v235_v51 = vpop.f32.mrf.mxu0 }
  0x9e   :  { %v266_v55 = vpop.f32.mrf.mxu1 }
  0xa1   :  { %v157_v41 = vpop.f32.mrf.mxu2 }
  0xa2   :  { %v158_v43 = vadd.f32 %v157_v41, %v124_v40 }
  0xa3   :  { %v192_v44 = vpop.f32.mrf.mxu3 }
  0xa4   :  { %v193_v45 = vadd.f32 %v192_v44, %v158_v43 }
  0xa5   :  { %v239_v3 = vpop.f32.mrf.mxu0 }
  0xa6   :  { %v232_v46 = vadd.f32 %v231_v39, %v193_v45  ;;  %v270_v7 = vpop.f32.mrf.mxu1 }
  0xa8   :  { %v263_v48 = vadd.f32 %v262_v42, %v232_v46 }
  0xa9   :  { %v162_v50 = vpop.f32.mrf.mxu2 }
  0xaa   :  { %v283_v52 = vmax.f32 %v263_v48, 0.0  ;;  %v163_v53 = vadd.f32 %v162_v50, %v128_v47 }
  0xab   :  { %v198_v54 = vpop.f32.mrf.mxu3 }
  0xac   :  { %366 = vlog2.f32 %v283_v52  ;;  %v199_v56 = vadd.f32 %v198_v54, %v163_v53 }
  0xae   :  { %v236_v58 = vadd.f32 %v235_v51, %v199_v56 }
  0xb0   :  { %v267_v60 = vadd.f32 %v266_v55, %v236_v58 }
  0xb1   :  { %v167_v62 = vpop.f32.mrf.mxu2 }
  0xb2   :  { %v367_v63 = vpop.eup %366  ;;  %v284_v0 = vmax.f32 %v267_v60, 0.0  ;;  %v168_v1 = vadd.f32 %v167_v62, %v132_v59 }
  0xb3   :  { %v204_v2 = vpop.f32.mrf.mxu3  ;;  %v287_v4 = vmul.f32 0.6931472, %v367_v63 }
  0xb4   :  { %368 = vlog2.f32 %v284_v0  ;;  %v205_v5 = vadd.f32 %v204_v2, %v168_v1 }
  0xb5   :  { %v293_v6 = vsel %vm292_vm1, %v287_v4, 0.0 }
  0xb6   :  { %v240_v8 = vadd.f32 %v239_v3, %v205_v5  ;;  %294 = vadd.xlane.f32.xlu0 %v293_v6 }
  0xb8   :  { %v271_v11 = vadd.f32 %v270_v7, %v240_v8 }
  0xba   :  { %v369_v12 = vpop.eup %368  ;;  %v285_v13 = vmax.f32 %v271_v11, %v282_v10 }
  0xbb   :  { %v289_v14 = vmul.f32 0.6931472, %v369_v12 }
  0xbc   :  { %370 = vlog2.f32 %v285_v13 }
  0xbd   :  { %v296_v15 = vsel %vm292_vm1, %v289_v14, 0.0 }
  0xbe   :  { %297 = vadd.xlane.f32.xlu0 %v296_v15 }
  0xc2   :  { %v371_v16 = vpop.eup %370 }
  0xc3   :  { %v291_v17 = vmul.f32 0.6931472, %v371_v16 }
  0xc5   :  { %v300_v18 = vsel %vm299_vm3, %v291_v17, 0.0 }
  0xc6   :  { %301 = vadd.xlane.f32.xlu1 %v300_v18 }
 0x129   :  { %v295_v19 = vpop.xlane.xlu0 %294 }
 0x12a   :  { %v309_v24 = vmul.f32 %v303_v21, %v295_v19 }
 0x12c   :  { %v312_v27 = vsel %vm306_vm5, %v309_v24, 0.0 }
 0x12d   :  { %v316_v31 = vsel %vm315_vm6, %v312_v27, 0.0 }
 0x131   :  { %v298_v22 = vpop.xlane.xlu0 %297 }
 0x132   :  { %v310_v23 = vmul.f32 %v304_v20, %v298_v22 }
 0x134   :  { %v313_v25 = vsel %vm307_vm4, %v310_v23, 0.0 }
 0x135   :  { %v317_v28 = vsel %vm315_vm6, %v313_v25, 0.0 }
 0x136   :  { %v318_v33 = vadd.f32 %v317_v28, %v316_v31 }
 0x139   :  { %v302_v29 = vpop.xlane.xlu1 %301 }
 0x13a   :  { %v311_v30 = vmul.f32 %v305_v26, %v302_v29 }
 0x13c   :  { %v314_v32 = vsel %vm308_vm7, %v311_v30, 0.0 }
 0x13d   :  { %v320_v34 = vsel %vm319_vm8, %v314_v32, 0.0 }
 0x13e   :  { %v321_v35 = vadd.f32 %v320_v34, %v318_v33 }
 0x140   :  { %322 = vadd.xlane.f32.xlu1 %v321_v35 }
 0x1b3   :  { %v323_v36 = vpop.xlane.xlu1 %322 }
 0x1b4   :  { %v324_v37 = vrot.slane %v323_v36, 4 }
 0x1b6   :  { %v325_v38 = vadd.f32 %v324_v37, %v323_v36 }
 0x1b8   :  { %v326_v39 = vrot.slane %v325_v38, 2 }
 0x1ba   :  { %v327_v40 = vadd.f32 %v326_v39, %v325_v38 }
 0x1bc   :  { %v328_v41 = vrot.slane %v327_v40, 1 }
 0x1be   :  { %v329_v42 = vadd.f32 %v328_v41, %v327_v40 }
 0x1c0   :  { %362 = vpush %v329_v42 }
 0x1f1   :  { %s363_s1 = spop %362 }
 0x1f2   :  { %v331_v43 = vstv %s363_s1 }
 0x1f3   :  { %v332_v44 = vsub.f32 0.0, %v331_v43 }
 0x1f5   :  { %335 = vst [vmem:[#allocation2] sm:$0xff] %v332_v44 }
 0x1f6   :  { %346 = dma.vmem_to_hbm [thread:$0]  %s342_s27, 128, %s344_s30, [#allocation3]  }
 0x1f7   :  { %396 = dma.done.wait [#allocation3], 128  }
 0x1f8   :  { %397 = vsyncadd [#allocation3], 4294967168 }
 0x1f9   :  { %351 = vsyncpa [#allocation3], 1 }

</bundles_post_ra>
